<compile_context>
chip_gen: v6e
topology: v6e:2x2x1
jax: 0.10.0
libtpu: 0.0.40
codegen_flags: <defaults>
</compile_context>

<pallas_src>
import jax
import jax.numpy as jnp
from jax import lax
from jax.experimental import pallas as pl
from jax.experimental.pallas import tpu as pltpu

MAX_TILE_N = 512  # upper bound on the lane-dense batch tile (multiple of 128)


def _tpu_has_bf16_vpu():
    """True on v6e / v7x (bf16 VALU + bf16 EUP); False on v5e / unknown."""
    try:
        kind = jax.devices()[0].device_kind.lower()
    except Exception:
        return False
    return any(tag in kind for tag in ("v6", "v7", "7x"))


def _pick_tile_n(n, max_tile_n):
    """Lane-dense (multiple of 128) batch tile. Aims for >=2 tiles when there
    is enough work so v7x megacore gets both TensorCores busy; a tiny batch
    collapses to a single 128-lane tile (grid=(1,))."""
    chunks = pl.cdiv(n, 128)
    if chunks <= 1:
        return 128
    return min(max_tile_n, pl.cdiv(chunks, 2) * 128)


def _make_fused_mlp_kernel(n_layers, epi_dtype):
    """Kernel body for the whole MLP: refs = (x, w0, b0, ..., wL, bL, out)."""

    def kernel(x_ref, *refs):
        o_ref = refs[-1]
        wb = refs[:-1]
        a = x_ref[...]                                   # bf16 (d_in, tile_n)
        for j in range(n_layers):
            w = wb[2 * j][...]                           # bf16 (d_out_j, d_in_j)
            b = wb[2 * j + 1][...]                       # epi  (d_out_j, 1)
            # MXU matmul with f32 accumulation; operands are bf16.
            z = jnp.dot(w, a.astype(jnp.bfloat16),
                        preferred_element_type=jnp.float32)
            z = z.astype(epi_dtype) + b
            # sigmoid(z) = 0.5*(tanh(z/2)+1) -> single EUP transcendental.
            a = 0.5 * (jnp.tanh(0.5 * z) + 1.0)          # epi_dtype
        o_ref[...] = a.astype(o_ref.dtype)

    return kernel


def fused_mlp_forward(x, weights, biases, *, max_tile_n=MAX_TILE_N,
                      epi_dtype=None):
    """sigmoid(W_L @ ... sigmoid(W_1 @ x + b_1) ... + b_L), one pallas_call.

    x: (d_in, n) with the batch on the last (lane) axis, matching FCNetFS.
    """
    d_in, n = x.shape
    d_out = weights[-1].shape[0]
    n_layers = len(weights)
    if epi_dtype is None:
        epi_dtype = jnp.bfloat16 if _tpu_has_bf16_vpu() else jnp.float32
    epi_bytes = 2 if epi_dtype == jnp.bfloat16 else 4

    tile_n = _pick_tile_n(n, max_tile_n)
    grid = (pl.cdiv(n, tile_n),)
    n_pad = grid[0] * tile_n

    # Input is bf16 on the MXU anyway -> DMA it as bf16. No wrapper pad/slice:
    # Pallas masks the partial last tile (columns are fully independent, the
    # padded lanes are dead work whose stores are dropped).
    x_bf16 = x.astype(jnp.bfloat16)

    in_specs = [pl.BlockSpec((d_in, tile_n), lambda i: (0, i))]
    wb_args = []
    for w, b in zip(weights, biases):
        od, idim = w.shape
        # Full-array blocks with constant index_map -> DMA'd once, VMEM-resident.
        in_specs.append(pl.BlockSpec((od, idim), lambda i: (0, 0)))
        in_specs.append(pl.BlockSpec((od, 1), lambda i: (0, 0)))
        wb_args.append(w.astype(jnp.bfloat16))
        wb_args.append(b.reshape(od, 1).astype(epi_dtype))

    # Explicit VMEM budget: resident weights/biases + double-buffered input and
    # output tiles + intermediate activations, with 4x headroom, capped well
    # under v7x's 64 MiB/TC (weights are duplicated per TensorCore there).
    w_bytes = sum(int(w.size) * 2 + w.shape[0] * epi_bytes for w in weights)
    io_bytes = 2 * (d_in * tile_n * 2 + d_out * tile_n * 4)
    inter_bytes = sum(w.shape[0] for w in weights) * tile_n * 4
    vmem_limit = int(min(64 << 20,
                         max(16 << 20, 4 * (w_bytes + io_bytes + inter_bytes))))

    flops = 2 * sum(int(w.size) for w in weights) * n_pad
    transcendentals = sum(w.shape[0] for w in weights) * n_pad
    bytes_accessed = d_in * n * 2 + d_out * n * 4 + w_bytes

    return pl.pallas_call(
        _make_fused_mlp_kernel(n_layers, epi_dtype),
        out_shape=jax.ShapeDtypeStruct((d_out, n), jnp.float32),
        grid=grid,
        in_specs=in_specs,
        out_specs=pl.BlockSpec((d_out, tile_n), lambda i: (0, i)),
        compiler_params=pltpu.CompilerParams(
            dimension_semantics=("parallel",),
            vmem_limit_bytes=vmem_limit),
        cost_estimate=pl.CostEstimate(
            flops=flops,
            transcendentals=transcendentals,
            bytes_accessed=bytes_accessed),
    )(x_bf16, *wb_args)


class FCNetFSPallas:
    """JAX/Pallas re-implementation of FCNetFS.forward (inference path)."""

    def __init__(self, dims, key):
        self.dims = list(dims)
        self.weights = []
        self.bias = []
        for j in range(len(dims) - 1):
            key, kw, kb = jax.random.split(key, 3)
            # np.random.random([out, in]) - 0.5  -> uniform in [-0.5, 0.5)
            w = jax.random.uniform(kw, (dims[j + 1], dims[j]),
                                   dtype=jnp.float32) - 0.5
            b = jax.random.uniform(kb, (dims[j + 1],),
                                   dtype=jnp.float32) - 0.5
            self.weights.append(w)
            self.bias.append(b)
        self.epi_dtype = jnp.bfloat16 if _tpu_has_bf16_vpu() else jnp.float32

    def forward(self, x):
        return fused_mlp_forward(x.astype(jnp.float32),
                                 self.weights, self.bias,
                                 epi_dtype=self.epi_dtype)

    # ---- plain-JAX references for verification --------------------------
    def forward_reference(self, x):
        """Pure f32 reference (the original FCNetFS math)."""
        a = x.astype(jnp.float32)
        for w, b in zip(self.weights, self.bias):
            z = jnp.dot(w, a, precision=lax.Precision.HIGHEST) + b[:, None]
            a = 1.0 / (1.0 + jnp.exp(-z))
        return a

    def forward_reference_kernel_dtypes(self, x):
        """Reference that emulates the kernel's exact dtype path."""
        epi = self.epi_dtype
        a = x.astype(jnp.bfloat16)
        for w, b in zip(self.weights, self.bias):
            w16 = w.astype(jnp.bfloat16).astype(jnp.float32)
            a16 = a.astype(jnp.bfloat16).astype(jnp.float32)
            z = jnp.dot(w16, a16, precision=lax.Precision.HIGHEST)
            z = z.astype(epi) + b[:, None].astype(epi)
            a = 0.5 * (jnp.tanh(0.5 * z) + 1.0)
        return a.astype(jnp.float32)


if __name__ == "__main__":
    key = jax.random.PRNGKey(0)
    key, kx1, kx2 = jax.random.split(key, 3)

    # Shapes consistent with the module: dims = [in, hidden, out].
    dims = [16, 32, 8]
    model = FCNetFSPallas(dims, key)

    # bf16 epilogue (v6e/v7x) is a few bf16 ulps looser than the f32 one.
    tol = 2e-2 if model.epi_dtype == jnp.bfloat16 else 2e-3

    # Test 1: tiny batch (8) -> one partial 128-lane tile, no wrapper pad/slice.
    x1 = jax.random.uniform(kx1, (dims[0], 8), dtype=jnp.float32)
    y1 = jax.block_until_ready(model.forward(x1))
    assert y1.shape == (dims[-1], 8)
    assert jnp.allclose(y1, model.forward_reference_kernel_dtypes(x1),
                        atol=tol, rtol=tol)
    # Loose check vs the exact-f32 reference (bf16 quantization gap).
    assert jnp.allclose(y1, model.forward_reference(x1), atol=1e-1)

    # Test 2: batch 200 -> two 128-lane tiles (megacore-shardable), the second
    # one partial/masked by Pallas itself.
    x2 = jax.random.uniform(kx2, (dims[0], 200), dtype=jnp.float32)
    y2 = jax.block_until_ready(model.forward(x2))
    assert y2.shape == (dims[-1], 200)
    assert jnp.allclose(y2, model.forward_reference_kernel_dtypes(x2),
                        atol=tol, rtol=tol)
    assert jnp.allclose(y2, model.forward_reference(x2), atol=1e-1)

    print("KERNEL_OK")
</pallas_src>

<mosaic_0001>
module attributes {stable_mosaic.version = 11 : i64} {
  func.func @kernel(%arg0: i32, %arg1: memref<16x128xbf16, #tpu.memory_space<vmem>>, %arg2: memref<32x16xbf16, #tpu.memory_space<vmem>>, %arg3: memref<32x1xf32, #tpu.memory_space<vmem>>, %arg4: memref<8x32xbf16, #tpu.memory_space<vmem>>, %arg5: memref<8x1xf32, #tpu.memory_space<vmem>>, %arg6: memref<8x128xf32, #tpu.memory_space<vmem>>) attributes {dimension_semantics = [#tpu.dimension_semantics<parallel>], iteration_bounds = array<i64: 1>, scalar_prefetch = 0 : i64, scratch_operands = 0 : i64, tpu.core_type = #tpu.core_type<tc>, window_params = [{transform_indices = @transform_0, window_bounds = array<i64: 16, 128>}, {pipeline_mode = #tpu.pipeline_mode<synchronous>, transform_indices = @transform_1, window_bounds = array<i64: 32, 16>}, {pipeline_mode = #tpu.pipeline_mode<synchronous>, transform_indices = @transform_2, window_bounds = array<i64: 32, 1>}, {pipeline_mode = #tpu.pipeline_mode<synchronous>, transform_indices = @transform_3, window_bounds = array<i64: 8, 32>}, {pipeline_mode = #tpu.pipeline_mode<synchronous>, transform_indices = @transform_4, window_bounds = array<i64: 8, 1>}, {transform_indices = @transform_5, window_bounds = array<i64: 8, 128>}]} {
    %c0 = arith.constant 0 : index
    %c0_0 = arith.constant 0 : index
    %0 = vector.load %arg1[%c0, %c0_0] : memref<16x128xbf16, #tpu.memory_space<vmem>>, vector<16x128xbf16>
    %c0_1 = arith.constant 0 : index
    %c0_2 = arith.constant 0 : index
    %1 = vector.load %arg2[%c0_1, %c0_2] : memref<32x16xbf16, #tpu.memory_space<vmem>>, vector<32x16xbf16>
    %c0_3 = arith.constant 0 : index
    %c0_4 = arith.constant 0 : index
    %2 = vector.load %arg3[%c0_3, %c0_4] : memref<32x1xf32, #tpu.memory_space<vmem>>, vector<32x1xf32>
    %cst = arith.constant dense<0.000000e+00> : vector<32x128xf32>
    %3 = tpu.matmul %1, %0, %cst {dimension_numbers = #tpu.dot_dimension_numbers<[1], [0], [0], [1], [0, 0, 1, 1], [], []>} : vector<32x16xbf16>, vector<16x128xbf16>, vector<32x128xf32> -> vector<32x128xf32>
    %4 = vector.broadcast %2 : vector<32x1xf32> to vector<32x128xf32>
    %5 = arith.addf %3, %4 : vector<32x128xf32>
    %cst_5 = arith.constant 5.000000e-01 : f32
    %6 = vector.broadcast %cst_5 : f32 to vector<32x128xf32>
    %7 = arith.mulf %6, %5 : vector<32x128xf32>
    %8 = math.tanh %7 : vector<32x128xf32>
    %cst_6 = arith.constant 1.000000e+00 : f32
    %9 = vector.broadcast %cst_6 : f32 to vector<32x128xf32>
    %10 = arith.addf %8, %9 : vector<32x128xf32>
    %cst_7 = arith.constant 5.000000e-01 : f32
    %11 = vector.broadcast %cst_7 : f32 to vector<32x128xf32>
    %12 = arith.mulf %11, %10 : vector<32x128xf32>
    %c0_8 = arith.constant 0 : index
    %c0_9 = arith.constant 0 : index
    %13 = vector.load %arg4[%c0_8, %c0_9] : memref<8x32xbf16, #tpu.memory_space<vmem>>, vector<8x32xbf16>
    %c0_10 = arith.constant 0 : index
    %c0_11 = arith.constant 0 : index
    %14 = vector.load %arg5[%c0_10, %c0_11] : memref<8x1xf32, #tpu.memory_space<vmem>>, vector<8x1xf32>
    %15 = arith.truncf %12 : vector<32x128xf32> to vector<32x128xbf16>
    %cst_12 = arith.constant dense<0.000000e+00> : vector<8x128xf32>
    %16 = tpu.matmul %13, %15, %cst_12 {dimension_numbers = #tpu.dot_dimension_numbers<[1], [0], [0], [1], [0, 0, 1, 1], [], []>} : vector<8x32xbf16>, vector<32x128xbf16>, vector<8x128xf32> -> vector<8x128xf32>
    %17 = vector.broadcast %14 : vector<8x1xf32> to vector<8x128xf32>
    %18 = arith.addf %16, %17 : vector<8x128xf32>
    %cst_13 = arith.constant 5.000000e-01 : f32
    %19 = vector.broadcast %cst_13 : f32 to vector<8x128xf32>
    %20 = arith.mulf %19, %18 : vector<8x128xf32>
    %21 = math.tanh %20 : vector<8x128xf32>
    %cst_14 = arith.constant 1.000000e+00 : f32
    %22 = vector.broadcast %cst_14 : f32 to vector<8x128xf32>
    %23 = arith.addf %21, %22 : vector<8x128xf32>
    %cst_15 = arith.constant 5.000000e-01 : f32
    %24 = vector.broadcast %cst_15 : f32 to vector<8x128xf32>
    %25 = arith.mulf %24, %23 : vector<8x128xf32>
    %c0_16 = arith.constant 0 : index
    %c0_17 = arith.constant 0 : index
    %26 = vector.load %arg6[%c0_16, %c0_17] : memref<8x128xf32, #tpu.memory_space<vmem>>, vector<8x128xf32>
    tpu.vector_store %arg6[%c0_16, %c0_17], %25 {strides = array<i32>} : memref<8x128xf32, #tpu.memory_space<vmem>>, vector<8x128xf32>,
    return
  }
  func.func @transform_0(%arg0: i32) -> (i32, i32) {
    %c0_i32 = arith.constant 0 : i32
    %c0_i32_0 = arith.constant 0 : i32
    return %c0_i32, %arg0 : i32, i32
  }
  func.func @transform_1(%arg0: i32) -> (i32, i32) {
    %c0_i32 = arith.constant 0 : i32
    %c0_i32_0 = arith.constant 0 : i32
    %c0_i32_1 = arith.constant 0 : i32
    return %c0_i32, %c0_i32_0 : i32, i32
  }
  func.func @transform_2(%arg0: i32) -> (i32, i32) {
    %c0_i32 = arith.constant 0 : i32
    %c0_i32_0 = arith.constant 0 : i32
    %c0_i32_1 = arith.constant 0 : i32
    return %c0_i32, %c0_i32_0 : i32, i32
  }
  func.func @transform_3(%arg0: i32) -> (i32, i32) {
    %c0_i32 = arith.constant 0 : i32
    %c0_i32_0 = arith.constant 0 : i32
    %c0_i32_1 = arith.constant 0 : i32
    return %c0_i32, %c0_i32_0 : i32, i32
  }
  func.func @transform_4(%arg0: i32) -> (i32, i32) {
    %c0_i32 = arith.constant 0 : i32
    %c0_i32_0 = arith.constant 0 : i32
    %c0_i32_1 = arith.constant 0 : i32
    return %c0_i32, %c0_i32_0 : i32, i32
  }
  func.func @transform_5(%arg0: i32) -> (i32, i32) {
    %c0_i32 = arith.constant 0 : i32
    %c0_i32_0 = arith.constant 0 : i32
    return %c0_i32, %arg0 : i32, i32
  }
}

</mosaic_0001>

<bundles_post_ra>
// kernel: tpu_custom_call.1
= control target key start
LH: loop header
LB: loop body
LE: loop exit
PB: predicated region body
PF: predicated region fallthrough
CT: control target
= control target key end

     0   :  { %vm68_vm0 = vcmask 130048   ;;  %v279_v3 = vmov 0   ;;  %s343_s0 = inlined_call_operand.vmem [shape: bf16[16,8], index: 0, kind: input, shape index: {}]   ;;  %s344_s1 = inlined_call_operand.vmem [shape: bf16[32,16], index: 1, kind: input, shape index: {}]   ;;  %s345_s2 = inlined_call_operand.vmem [shape: f32[32,1], index: 2, kind: input, shape index: {}]   ;;  %s346_s3 = inlined_call_operand.vmem [shape: bf16[8,32], index: 3, kind: input, shape index: {}]   ;;  %s347_s4 = inlined_call_operand.vmem [shape: f32[8,1], index: 4, kind: input, shape index: {}]   ;;  %s348_s5 = inlined_call_operand.hbm [shape: f32[8,8], index: 5, kind: output, shape index: {}]  }
   0x1   :  { %v244_v0 = vld [vmem:[%s343_s0] sm:$0xff]   ;;  %v246_v2 = vld [vmem:[%s344_s1 + $0x8] sm:$0xff]   ;;  %242 = vset.pattern.permute.xlu0 %v279_v3  ;;  %v30_v4 = vld [vmem:[%s345_s2 + $0x10] sm:$0xff]  ;;  %243 = vset.pattern.permute.xlu1 %v279_v3 }
   0x2   :  { %v245_v1 = vld [vmem:[%s344_s1] sm:$0xff]   ;;  %224 = vmatprep.subr.bf16.mxu0 %v244_v0  ;;  %44 = vperm.xlu0 %242, %v30_v4  }
   0x3   :  { %225 = vmatpush3.bf16.msra.mxu0 %v244_v0  ;;  %226 = vmatprep.mubr.msk.bf16.mxu0 %vm68_vm0, %v245_v1  ;;  %v28_v5 = vld [vmem:[%s345_s2] sm:$0xff] }
   0x4   :  { %10 = vsyncpa [#allocation3], 0  ;;  %v31_v6 = vld [vmem:[%s345_s2 + $0x18] sm:$0xff]  ;;  %34 = vperm.xlu1 %243, %v28_v5   ;;  %v29_v7 = vld [vmem:[%s345_s2 + $0x8] sm:$0xff]  ;;  %v280_v9 = vmov 0.0   ;;  %vm281_vm1 = vmmov 0  }
   0x5   :  { %v141_v8 = vld [vmem:[%s347_s4] sm:$0xff]  ;;  %230 = vmatprep.subr.bf16.mxu1 %v280_v9  ;;  %234 = vmatprep.mubr.msk.bf16.mxu1 %vm281_vm1, %v280_v9  ;;  %vm149_vm2 = vcmask 261120   ;;  %s282_s7 = smov [#allocation2]  }
   0x6   :  { %227 = vmatmul.mubr.msk.bf16.vlgmr.msra.gmra.mxu0 %vm68_vm0, %v246_v2  ;;  %49 = vperm.xlu0 %242, %v31_v6   ;;  %v140_v40 = vld [vmem:[%s346_s3] sm:$0xf]  ;;  %s204_s8 = sshll.u32 %s282_s7, 4  ;;  %s205_s8 = int_to_ptr.vmem [resolvable:$true] %s204_s8 }
   0x7   :  { %s257_s9 = scalar_lea.vmem %s205_s8, 128  ;;  %p262_p1 = scmp.lt.s32.totalorder %s205_s8, %s205_s8 }
   0x8   :  { %39 = vperm.xlu1 %243, %v29_v7   ;;  %p258_p0 = scmp.ne.s32.totalorder %s205_s8, %s257_s9  ;;  %p263_p2 = scmp.lt.s32.totalorder %s257_s9, %s257_s9 }
   0xa   :  { %146 = vperm.xlu0 %242, %v141_v8   ;;  %p264_p3 = por %p263_p2, %p262_p1 }
   0xc   :  { %p265_p4 = pnand %p264_p3, %p258_p0 }
  0x7d   :  { %v45_v10 = vpop.permute.xlu0 %44 }
  0x7f   :  { %v35_v11 = vpop.permute.xlu1 %34 }
  0x81   :  { %v50_v17 = vpop.permute.xlu0 %49 }
  0x83   :  { %v40_v21 = vpop.permute.xlu1 %39 }
  0x85   :  { %v147_v41 = vpop.permute.xlu0 %146 }
  0xc6   :  { %v228_v12 = vpop.f32.mrf.mxu0 }
  0xc7   :  { %v118_v13 = vadd.f32 %v228_v12, %v45_v10 }
  0xc8   :  { %v109_v14 = vpop.f32.mrf.mxu0 }
  0xc9   :  { %v126_v15 = vmul.f32 0.5, %v118_v13  ;;  %v110_v16 = vadd.f32 %v109_v14, %v35_v11 }
  0xca   :  { %v229_v18 = vpop.f32.mrf.mxu0 }
  0xcb   :  { %247 = vtanh.f32 %v126_v15  ;;  %v124_v19 = vmul.f32 0.5, %v110_v16  ;;  %v121_v20 = vadd.f32 %v229_v18, %v50_v17 }
  0xcc   :  { %v112_v22 = vpop.f32.mrf.mxu0 }
  0xcd   :  { %v127_v23 = vmul.f32 0.5, %v121_v20  ;;  %v113_v24 = vadd.f32 %v112_v22, %v40_v21  ;;  %249 = vtanh.f32 %v124_v19 }
  0xcf   :  { %251 = vtanh.f32 %v127_v23  ;;  %v125_v25 = vmul.f32 0.5, %v113_v24 }
  0xd1   :  { %253 = vtanh.f32 %v125_v25 }
  0xd8   :  { %v248_v26 = vpop.eup %247 }
  0xd9   :  { %v134_v28 = vadd.f32 1.0, %v248_v26 }
  0xda   :  { %v250_v27 = vpop.eup %249 }
  0xdb   :  { %v132_v32 = vadd.f32 1.0, %v250_v27  ;;  %v138_v34 = vmul.f32 0.5, %v134_v28 }
  0xdc   :  { %v252_v29 = vpop.eup %251 }
  0xdd   :  { %v135_v30 = vadd.f32 1.0, %v252_v29  ;;  %v136_v38 = vmul.f32 0.5, %v132_v32 }
  0xde   :  { %v254_v31 = vpop.eup %253 }
  0xdf   :  { %v133_v33 = vadd.f32 1.0, %v254_v31  ;;  %v139_v35 = vmul.f32 0.5, %v135_v30 }
  0xe1   :  { %v137_v36 = vmul.f32 0.5, %v133_v33  ;;  %v143_v37 = vpack.c.bf16 %v139_v35, %v138_v34 }
  0xe3   :  { %231 = vmatpush3.bf16.msra.mxu1 %v143_v37  ;;  %v142_v39 = vpack.c.bf16 %v137_v36, %v136_v38 }
  0xe4   :  { %232 = vmatprep.subr.bf16.mxu1 %v280_v9 }
  0xe7   :  { %233 = vmatpush3.bf16.msra.mxu1 %v142_v39 }
  0xea   :  { %235 = vmatmul.mubr.msk.bf16.vlgmr.msra.gmra.mxu1 %vm149_vm2, %v140_v40 }
 0x1aa   :  { %v187_v42 = vpop.f32.mrf.mxu1 }
 0x1ab   :  { %v188_v43 = vadd.f32 %v187_v42, %v147_v41 }
 0x1ac   :  { %v236_v44 = vpop.f32.mrf.mxu1 }
 0x1ad   :  { %v193_v45 = vmul.f32 0.5, %v188_v43 }
 0x1ae   :  { %v190_v46 = vpop.f32.mrf.mxu1 }
 0x1af   :  { %255 = vtanh.f32 %v193_v45 }
 0x1b0   :  { %v237_v47 = vpop.f32.mrf.mxu1 }
 0x1bc   :  { %v256_v48 = vpop.eup %255 }
 0x1bd   :  { %v195_v49 = vadd.f32 1.0, %v256_v48 }
 0x1bf   :  { %v196_v50 = vmul.f32 0.5, %v195_v49 }
 0x1c1   :  { %197 = vst [vmem:[#allocation2] sm:$0xff] %v196_v50 }
 0x1c2   :  { %268 = shalt.err (!%p265_p4)
}
 0x1c3   :  { %207 = dma.vmem_to_hbm [thread:$0]  %s205_s8, 128, %s348_s5, [#allocation3]  }
 0x1c4   :  { %277 = dma.done.wait [#allocation3], 128  }
 0x1c5   :  { %278 = vsyncadd [#allocation3], 4294967168 }
 0x1c6   :  { %211 = vsyncpa [#allocation3], 1 }

</bundles_post_ra>
